<compile_context>
chip_gen: v6e
topology: v6e:2x2x1
jax: 0.10.0
libtpu: 0.0.40
codegen_flags: <defaults>
</compile_context>

<pallas_src>
import jax
import jax.numpy as jnp
from jax.experimental import pallas as pl
from jax.experimental.pallas import tpu as pltpu

EPS = 1e-5


# --------------------------------------------------------------------------- #
# Helpers
# --------------------------------------------------------------------------- #
def _round_up(x, m):
    return ((x + m - 1) // m) * m


def _cdiv(a, b):
    return -(-a // b)


def _vmem_capacity_bytes():
    """Physical VMEM per TensorCore; conservative 64 MiB (v7x) fallback."""
    try:
        return int(pltpu.get_tpu_info().vmem_capacity_bytes)
    except Exception:
        return 64 * 1024 * 1024


def _pick_tile_n(D, tn_max):
    """Largest lane-dense divisor of D <= tn_max, preferring 256-aligned tiles
    (2x256x256 MXU on v6e/v7x), falling back to 128-aligned, else full D."""
    if D % 128 != 0 or D <= tn_max:
        return D
    for align in (256, 128):
        t = (tn_max // align) * align
        while t >= align:
            if D % t == 0:
                return t
            t -= align
    return D


def _largest_divisor(n, cap, align):
    for d in range(min(cap, n), align - 1, -1):
        if d % align == 0 and n % d == 0:
            return d
    return None


def _select_tiles(rows, D, x_itemsize, out_itemsize, matmul_dtype, budget, *,
                  tm_target, tn_max):
    """Pick (tm, tn, padded_rows) from a VMEM byte budget."""
    mm_itemsize = jnp.dtype(matmul_dtype).itemsize

    def per_row(tn):   # x double-buffer + out double-buffer + xn scratch
        return 2 * D * x_itemsize + 2 * tn * out_itemsize + D * mm_itemsize

    def fixed(tn):     # W' + b' double-buffers
        return 2 * D * tn * mm_itemsize + 2 * max(tn, 128) * 4

    # Resident-W decision: constant W index_map -> single HBM weight fetch.
    tm_gate = min(128, _round_up(rows, 16))
    if fixed(D) + tm_gate * per_row(D) <= budget:
        tn = D
    else:
        tn = _pick_tile_n(D, tn_max)

    # Largest 16-aligned row tile that fits the remaining budget.
    tm = max(16, (budget - fixed(tn)) // per_row(tn))
    tm = min(tm, tm_target)
    if rows >= 512:
        # Keep >= 2 row tiles so the "parallel" axis can feed both v7x cores.
        tm = min(tm, _round_up(_cdiv(rows, 2), 16))
    tm = min(tm, _round_up(rows, 16))
    tm = max(16, (tm // 16) * 16)

    # Prefer a divisor of `rows` -> no whole-tensor pad + slice copies.
    d = _largest_divisor(rows, tm, 16) or _largest_divisor(rows, tm, 8)
    if d is not None:
        # Small tiles are cheap when W is resident; otherwise keep tm large so
        # the weight is not re-streamed too often.
        min_ok = 64 if tn == D else max(64, tm // 2)
        if d >= min(min_ok, rows):
            return d, tn, rows
    return tm, tn, _round_up(rows, tm)


# --------------------------------------------------------------------------- #
# Kernel
# --------------------------------------------------------------------------- #
def prenorm_kernel(x_ref, w_ref, b_ref, o_ref, xn_ref):
    # x_ref : (TM, D)   input row tile
    # w_ref : (D, TN)   folded weight tile (bf16); resident when TN == D
    # b_ref : (1, TN)   folded bias tile (f32)
    # o_ref : (TM, TN)  output tile
    # xn_ref: (TM, D)   bf16 scratch: normalized rows, computed once per row
    #                   tile (j == 0) and reused for every N tile.
    @pl.when(pl.program_id(1) == 0)
    def _():
        x = x_ref[...].astype(jnp.float32)
        inv_d = jnp.float32(1.0 / x.shape[-1])
        mean = jnp.sum(x, axis=-1, keepdims=True) * inv_d
        mean_sq = jnp.sum(x * x, axis=-1, keepdims=True) * inv_d
        var = jnp.maximum(mean_sq - mean * mean, 0.0)   # f32, guard cancellation
        scale = jax.lax.rsqrt(var + EPS)                # EUP slot
        xn_ref[...] = ((x - mean) * scale).astype(xn_ref.dtype)

    # fn = Linear: xn @ W' + b'  (bf16 MXU operands, f32 accumulation)
    out = jnp.dot(xn_ref[...], w_ref[...], preferred_element_type=jnp.float32)
    o_ref[...] = (out + b_ref[...]).astype(o_ref.dtype)


# --------------------------------------------------------------------------- #
# Wrapper
# --------------------------------------------------------------------------- #
def prenorm_linear(x, gamma, beta, w, wb, *, matmul_dtype=jnp.bfloat16,
                   out_dtype=None, tm_target=1024, tn_max=512):
    """x: (B, S, D) -> fn(LayerNorm(x)) with fn = Linear(D, D)."""
    B, S, D = x.shape
    rows = B * S
    out_dtype = jnp.dtype(x.dtype if out_dtype is None else out_dtype)

    # One-time fold of the LayerNorm affine into the linear layer (f32):
    #   (xn*gamma + beta) @ W + wb = xn @ (gamma[:,None]*W) + (beta@W + wb)
    w32 = w.astype(jnp.float32)
    w_folded = (gamma.astype(jnp.float32)[:, None] * w32).astype(matmul_dtype)
    b_folded = (beta.astype(jnp.float32) @ w32
                + wb.astype(jnp.float32)).reshape(1, D)

    # Per-generation VMEM budgeting (128 MiB on v5e/v6e, 64 MiB on v7x).
    vmem_cap = _vmem_capacity_bytes()
    vmem_limit = int(vmem_cap * 3 // 4)
    budget = int(vmem_limit * 0.85)

    tm_eff, tn_eff, rows_p = _select_tiles(
        rows, D, jnp.dtype(x.dtype).itemsize, out_dtype.itemsize,
        matmul_dtype, budget, tm_target=tm_target, tn_max=tn_max)

    x2 = x.reshape(rows, D)
    if rows_p != rows:
        # Fallback only when no tile divides `rows`.  Padded rows normalize to
        # zero (centered == 0) and are sliced off below.
        x2 = jnp.pad(x2, ((0, rows_p - rows), (0, 0)))

    grid = (rows_p // tm_eff, D // tn_eff)

    out2 = pl.pallas_call(
        prenorm_kernel,
        out_shape=jax.ShapeDtypeStruct((rows_p, D), out_dtype),
        grid_spec=pltpu.PrefetchScalarGridSpec(
            num_scalar_prefetch=0,
            grid=grid,
            in_specs=[
                pl.BlockSpec((tm_eff, D), lambda i, j: (i, 0)),   # x rows
                pl.BlockSpec((D, tn_eff), lambda i, j: (0, j)),   # W' (fetched once if tn==D)
                pl.BlockSpec((1, tn_eff), lambda i, j: (0, j)),   # b'
            ],
            out_specs=pl.BlockSpec((tm_eff, tn_eff), lambda i, j: (i, j)),
            scratch_shapes=[pltpu.VMEM((tm_eff, D), matmul_dtype)],
        ),
        compiler_params=pltpu.CompilerParams(
            # Row axis is parallel (megacore-shardable); the N axis carries the
            # normalized-rows scratch across j, so it stays "arbitrary".
            dimension_semantics=("parallel", "arbitrary"),
            vmem_limit_bytes=vmem_limit,
        ),
    )(x2, w_folded, b_folded)

    if rows_p != rows:
        out2 = out2[:rows]
    return out2.reshape(B, S, D)


# --------------------------------------------------------------------------- #
# References
# --------------------------------------------------------------------------- #
def prenorm_reference_f32(x, gamma, beta, w, wb):
    """Pure f32 reference matching torch semantics."""
    xf = x.astype(jnp.float32)
    mean = jnp.mean(xf, axis=-1, keepdims=True)
    var = jnp.mean((xf - mean) ** 2, axis=-1, keepdims=True)
    xn = (xf - mean) * jax.lax.rsqrt(var + EPS)
    y = xn * gamma + beta
    return (y @ w + wb).astype(x.dtype)


def prenorm_reference_bf16(x, gamma, beta, w, wb, matmul_dtype=jnp.bfloat16):
    """Reference mirroring the kernel numerics (one-pass stats, bf16 MXU)."""
    xf = x.astype(jnp.float32)
    inv_d = 1.0 / x.shape[-1]
    mean = jnp.sum(xf, axis=-1, keepdims=True) * inv_d
    var = jnp.maximum(
        jnp.sum(xf * xf, axis=-1, keepdims=True) * inv_d - mean * mean, 0.0)
    xn = (xf - mean) * jax.lax.rsqrt(var + EPS)
    w32 = w.astype(jnp.float32)
    w_f = (gamma.astype(jnp.float32)[:, None] * w32).astype(matmul_dtype)
    b_f = beta.astype(jnp.float32) @ w32 + wb.astype(jnp.float32)
    out = jnp.dot(xn.astype(matmul_dtype), w_f,
                  preferred_element_type=jnp.float32) + b_f
    return out.astype(x.dtype)


# --------------------------------------------------------------------------- #
# Test harness
# --------------------------------------------------------------------------- #
if __name__ == "__main__":
    root = jax.random.PRNGKey(0)

    def make_case(B, S, D, key):
        kx, kw, kb, kg, kbt = jax.random.split(key, 5)
        x = jax.random.normal(kx, (B, S, D), dtype=jnp.float32)
        # LayerNorm params (perturbed around torch's ones/zeros init so the
        # affine fold is actually exercised).
        gamma = 1.0 + 0.1 * jax.random.normal(kg, (D,), dtype=jnp.float32)
        beta = 0.1 * jax.random.normal(kbt, (D,), dtype=jnp.float32)
        # fn = Linear(D, D): deterministic synthetic weights.
        w = jax.random.normal(kw, (D, D), dtype=jnp.float32) * 0.05
        wb = jax.random.normal(kb, (D,), dtype=jnp.float32) * 0.01
        return x, gamma, beta, w, wb

    # Case 1: small shape implied by the module (batch=2, seq=8, hidden=32).
    # Case 2: lane-dense D and ragged row count (exercises scratch reuse and
    #         the padded-rows fallback path).
    for (B, S, D) in [(2, 8, 32), (3, 12, 256)]:
        x, gamma, beta, w, wb = make_case(B, S, D, jax.random.fold_in(root, D))
        out = jax.block_until_ready(prenorm_linear(x, gamma, beta, w, wb))
        assert out.shape == (B, S, D) and out.dtype == x.dtype

        # Tight check vs. a reference doing the same bf16 matmul / stats.
        ref_bf16 = prenorm_reference_bf16(x, gamma, beta, w, wb)
        assert jnp.allclose(out, ref_bf16, atol=5e-3, rtol=5e-3), (B, S, D)

        # Loose check vs. pure-f32 (torch-semantics) reference; bf16 MXU
        # operands introduce ~1e-2 relative error.
        ref_f32 = prenorm_reference_f32(x, gamma, beta, w, wb)
        assert jnp.allclose(out, ref_f32, atol=5e-2, rtol=5e-2), (B, S, D)

    print("KERNEL_OK")
</pallas_src>

<mosaic_0001>
module attributes {stable_mosaic.version = 11 : i64} {
  func.func @prenorm_kernel(%arg0: i32, %arg1: i32, %arg2: memref<16x32xf32, #tpu.memory_space<vmem>>, %arg3: memref<32x32xbf16, #tpu.memory_space<vmem>>, %arg4: memref<1x32xf32, #tpu.memory_space<vmem>>, %arg5: memref<16x32xf32, #tpu.memory_space<vmem>>, %arg6: memref<16x32xbf16, #tpu.memory_space<vmem>>) attributes {dimension_semantics = [#tpu.dimension_semantics<parallel>, #tpu.dimension_semantics<arbitrary>], iteration_bounds = array<i64: 1, 1>, scalar_prefetch = 0 : i64, scratch_operands = 1 : i64, tpu.core_type = #tpu.core_type<tc>, window_params = [{transform_indices = @transform_0, window_bounds = array<i64: 16, 32>}, {transform_indices = @transform_1, window_bounds = array<i64: 32, 32>}, {transform_indices = @transform_2, window_bounds = array<i64: 1, 32>}, {transform_indices = @transform_3, window_bounds = array<i64: 16, 32>}]} {
    %c0_i32 = arith.constant 0 : i32
    %0 = arith.cmpi eq, %arg1, %c0_i32 : i32
    %1 = arith.extui %0 : i1 to i32
    %c0_i32_0 = arith.constant 0 : i32
    %2 = arith.cmpi ne, %1, %c0_i32_0 : i32
    scf.if %2 {
      %c0_8 = arith.constant 0 : index
      %c0_9 = arith.constant 0 : index
      %10 = vector.load %arg2[%c0_8, %c0_9] : memref<16x32xf32, #tpu.memory_space<vmem>>, vector<16x32xf32>
      %cst_10 = arith.constant dense<0.000000e+00> : vector<16xf32>
      %11 = vector.multi_reduction <add>, %10, %cst_10 [1] : vector<16x32xf32> to vector<16xf32>
      %12 = vector.shape_cast %11 : vector<16xf32> to vector<16x1xf32>
      %cst_11 = arith.constant 3.125000e-02 : f32
      %13 = vector.broadcast %cst_11 : f32 to vector<16x1xf32>
      %14 = arith.mulf %12, %13 : vector<16x1xf32>
      %15 = arith.mulf %10, %10 : vector<16x32xf32>
      %cst_12 = arith.constant dense<0.000000e+00> : vector<16xf32>
      %16 = vector.multi_reduction <add>, %15, %cst_12 [1] : vector<16x32xf32> to vector<16xf32>
      %17 = vector.shape_cast %16 : vector<16xf32> to vector<16x1xf32>
      %cst_13 = arith.constant 3.125000e-02 : f32
      %18 = vector.broadcast %cst_13 : f32 to vector<16x1xf32>
      %19 = arith.mulf %17, %18 : vector<16x1xf32>
      %20 = arith.mulf %14, %14 : vector<16x1xf32>
      %21 = arith.subf %19, %20 : vector<16x1xf32>
      %cst_14 = arith.constant 0.000000e+00 : f32
      %22 = vector.broadcast %cst_14 : f32 to vector<16x1xf32>
      %23 = arith.maximumf %21, %22 : vector<16x1xf32>
      %cst_15 = arith.constant 9.99999974E-6 : f32
      %24 = vector.broadcast %cst_15 : f32 to vector<16x1xf32>
      %25 = arith.addf %23, %24 : vector<16x1xf32>
      %26 = math.rsqrt %25 : vector<16x1xf32>
      %27 = vector.broadcast %14 : vector<16x1xf32> to vector<16x32xf32>
      %28 = arith.subf %10, %27 : vector<16x32xf32>
      %29 = vector.broadcast %26 : vector<16x1xf32> to vector<16x32xf32>
      %30 = arith.mulf %28, %29 : vector<16x32xf32>
      %31 = arith.truncf %30 : vector<16x32xf32> to vector<16x32xbf16>
      %c0_16 = arith.constant 0 : index
      %c0_17 = arith.constant 0 : index
      %32 = vector.load %arg6[%c0_16, %c0_17] : memref<16x32xbf16, #tpu.memory_space<vmem>>, vector<16x32xbf16>
      tpu.vector_store %arg6[%c0_16, %c0_17], %31 {strides = array<i32>} : memref<16x32xbf16, #tpu.memory_space<vmem>>, vector<16x32xbf16>,
    } else {
    }
    %c0 = arith.constant 0 : index
    %c0_1 = arith.constant 0 : index
    %3 = vector.load %arg6[%c0, %c0_1] : memref<16x32xbf16, #tpu.memory_space<vmem>>, vector<16x32xbf16>
    %c0_2 = arith.constant 0 : index
    %c0_3 = arith.constant 0 : index
    %4 = vector.load %arg3[%c0_2, %c0_3] : memref<32x32xbf16, #tpu.memory_space<vmem>>, vector<32x32xbf16>
    %cst = arith.constant dense<0.000000e+00> : vector<16x32xf32>
    %5 = tpu.matmul %3, %4, %cst {dimension_numbers = #tpu.dot_dimension_numbers<[1], [0], [0], [1], [0, 0, 1, 1], [], []>} : vector<16x32xbf16>, vector<32x32xbf16>, vector<16x32xf32> -> vector<16x32xf32>
    %c0_4 = arith.constant 0 : index
    %c0_5 = arith.constant 0 : index
    %6 = vector.load %arg4[%c0_4, %c0_5] : memref<1x32xf32, #tpu.memory_space<vmem>>, vector<1x32xf32>
    %7 = vector.broadcast %6 : vector<1x32xf32> to vector<16x32xf32>
    %8 = arith.addf %5, %7 : vector<16x32xf32>
    %c0_6 = arith.constant 0 : index
    %c0_7 = arith.constant 0 : index
    %9 = vector.load %arg5[%c0_6, %c0_7] : memref<16x32xf32, #tpu.memory_space<vmem>>, vector<16x32xf32>
    tpu.vector_store %arg5[%c0_6, %c0_7], %8 {strides = array<i32>} : memref<16x32xf32, #tpu.memory_space<vmem>>, vector<16x32xf32>,
    return
  }
  func.func @transform_0(%arg0: i32, %arg1: i32) -> (i32, i32) {
    %c0_i32 = arith.constant 0 : i32
    %c0_i32_0 = arith.constant 0 : i32
    return %arg0, %c0_i32 : i32, i32
  }
  func.func @transform_1(%arg0: i32, %arg1: i32) -> (i32, i32) {
    %c0_i32 = arith.constant 0 : i32
    %c0_i32_0 = arith.constant 0 : i32
    return %c0_i32, %arg1 : i32, i32
  }
  func.func @transform_2(%arg0: i32, %arg1: i32) -> (i32, i32) {
    %c0_i32 = arith.constant 0 : i32
    %c0_i32_0 = arith.constant 0 : i32
    return %c0_i32, %arg1 : i32, i32
  }
  func.func @transform_3(%arg0: i32, %arg1: i32) -> (i32, i32) {
    %c0_i32 = arith.constant 0 : i32
    return %arg0, %arg1 : i32, i32
  }
}

</mosaic_0001>

<bundles_post_ra>
// kernel: tpu_custom_call.1
= control target key start
LH: loop header
LB: loop body
LE: loop exit
PB: predicated region body
PF: predicated region fallthrough
CT: control target
= control target key end

     0   :  { %8 = vsyncpa [#allocation4], 0  ;;  %s345_s0 = inlined_call_operand.hbm [shape: f32[16,32], index: 0, kind: input, shape index: {}]   ;;  %s346_s1 = inlined_call_operand.hbm [shape: bf16[32,32], index: 1, kind: input, shape index: {}]   ;;  %s347_s2 = inlined_call_operand.vmem [shape: f32[1,32], index: 2, kind: input, shape index: {}]   ;;  %s348_s3 = inlined_call_operand.hbm [shape: f32[16,32], index: 3, kind: output, shape index: {}]  }
   0x1   :  { %9 = vsyncpa [#allocation7], 0 }
   0x2   :  { %10 = vsyncpa [#allocation5], 0  ;;  %s291_s12 = smov [#allocation3]  }
   0x3   :  { %s16_s13 = sshll.u32 %s291_s12, 4  ;;  %s17_s13 = int_to_ptr.vmem [resolvable:$true] %s16_s13 }
   0x4   :  { %s233_s14 = scalar_lea.vmem %s17_s13, 256  ;;  %p238_p1 = scmp.lt.s32.totalorder %s17_s13, %s17_s13 }
   0x5   :  { %p234_p0 = scmp.ne.s32.totalorder %s17_s13, %s233_s14  ;;  %p239_p2 = scmp.lt.s32.totalorder %s233_s14, %s233_s14 }
   0x7   :  { %p240_p3 = por %p239_p2, %p238_p1 }
   0x9   :  { %p241_p4 = pnand %p240_p3, %p234_p0 }
   0xb   :  { %244 = shalt.err (!%p241_p4)
}
   0xc   :  { %s292_s15 = smov 128   ;;  %s293_s16 = smov 8  }
   0xd   :  { %22 = dma.hbm_to_vmem [thread:$0]  %s345_s0, 256, %s17_s13, [#allocation4], %s292_s15, %s292_s15, %s293_s16  }
   0xe   :  { %s294_s19 = smov [#allocation6]  }
   0xf   :  { %s28_s20 = sshll.u32 %s294_s19, 4  ;;  %s29_s20 = int_to_ptr.vmem [resolvable:$true] %s28_s20 }
  0x10   :  { %s253_s21 = scalar_lea.vmem %s29_s20, 256  ;;  %p258_p6 = scmp.lt.s32.totalorder %s29_s20, %s29_s20 }
  0x11   :  { %p254_p5 = scmp.ne.s32.totalorder %s29_s20, %s253_s21  ;;  %p259_p7 = scmp.lt.s32.totalorder %s253_s21, %s253_s21 }
  0x13   :  { %p260_p8 = por %p259_p7, %p258_p6 }
  0x15   :  { %p261_p9 = pnand %p260_p8, %p254_p5 }
  0x17   :  { %264 = shalt.err (!%p261_p9)
}
  0x18   :  { %s295_s22 = smov 64   ;;  %s296_s23 = smov 4  }
  0x19   :  { %34 = dma.hbm_to_vmem [thread:$0]  %s346_s1, 256, %s29_s20, [#allocation7], %s295_s22, %s295_s22, %s296_s23  }
  0x1a   :  { %285 = dma.done.wait [#allocation4], 256  }
  0x1b   :  { %286 = vsyncadd [#allocation4], 4294967040 }
  0x1c   :  { %287 = dma.done.wait [#allocation7], 256  }
  0x1d   :  { %288 = vsyncadd [#allocation7], 4294967040  ;;  %vm50_vm0 = vcmask 261120   ;;  %v48_v0 = vld [vmem:[#allocation3] sm:$0xff]  ;;  %v49_v1 = vld [vmem:[#allocation3 + $0x8] sm:$0xff]  ;;  %v297_v9 = vmov 0.0  }
  0x1e   :  { %v51_v2 = vsel %vm50_vm0, %v48_v0, 0.0  ;;  %v59_v3 = vmul.f32 %v48_v0, %v48_v0  ;;  %v60_v4 = vmul.f32 %v49_v1, %v49_v1  ;;  %v54_v6 = vsel %vm50_vm0, %v49_v1, 0.0  ;;  %v218_v8 = vld [vmem:[#allocation6 + $0x8] sm:$0xff]   ;;  %201 = vmatprep.subr.bf16.mxu0 %v297_v9  ;;  %v219_v10 = vld [vmem:[#allocation6] sm:$0xff]   ;;  %s299_s26 = smov [#allocation8]  }
  0x1f   :  { %52 = vadd.xlane.f32.xlu0 %v51_v2  ;;  %vm298_vm1 = vmmov 0   ;;  %202 = vmatpush3.bf16.msra.mxu0 %v218_v8  ;;  %vm91_vm2 = vcmask 257024   ;;  %v191_v36 = vld [vmem:[%s347_s2] ss:$0 sm:$0xff]  ;;  %s176_s27 = sshll.u32 %s299_s26, 4  ;;  %s177_s27 = int_to_ptr.vmem [resolvable:$true] %s176_s27 }
  0x20   :  { %v61_v5 = vsel %vm50_vm0, %v59_v3, 0.0  ;;  %v64_v7 = vsel %vm50_vm0, %v60_v4, 0.0  ;;  %205 = vmatprep.mubr.msk.bf16.mxu0 %vm298_vm1, %v297_v9  ;;  %203 = vmatprep.subr.bf16.mxu0 %v297_v9  ;;  %s265_s28 = scalar_lea.vmem %s177_s27, 256  ;;  %p270_p11 = scmp.lt.s32.totalorder %s177_s27, %s177_s27 }
  0x21   :  { %62 = vadd.xlane.f32.xlu1 %v61_v5  ;;  %p266_p10 = scmp.ne.s32.totalorder %s177_s27, %s265_s28  ;;  %p271_p12 = scmp.lt.s32.totalorder %s265_s28, %s265_s28 }
  0x23   :  { %55 = vadd.xlane.f32.xlu0 %v54_v6  ;;  %204 = vmatpush3.bf16.msra.mxu0 %v219_v10  ;;  %p272_p13 = por %p271_p12, %p270_p11 }
  0x25   :  { %65 = vadd.xlane.f32.xlu1 %v64_v7  ;;  %p273_p0 = pnand %p272_p13, %p266_p10 }
  0xa8   :  { %v53_v11 = vpop.xlane.xlu0 %52 }
  0xa9   :  { %v57_v12 = vmul.f32 0.03125, %v53_v11 }
  0xaa   :  { %v63_v13 = vpop.xlane.xlu1 %62 }
  0xab   :  { %v69_v14 = vmul.f32 %v57_v12, %v57_v12  ;;  %v67_v15 = vmul.f32 0.03125, %v63_v13  ;;  %v79_v27 = vsub.f32 %v48_v0, %v57_v12 }
  0xac   :  { %v56_v16 = vpop.xlane.xlu0 %55 }
  0xad   :  { %v71_v17 = vsub.f32 %v67_v15, %v69_v14  ;;  %v58_v18 = vmul.f32 0.03125, %v56_v16 }
  0xae   :  { %v66_v19 = vpop.xlane.xlu1 %65 }
  0xaf   :  { %v73_v20 = vmax.f32 %v71_v17, 0.0  ;;  %v70_v21 = vmul.f32 %v58_v18, %v58_v18  ;;  %v68_v22 = vmul.f32 0.03125, %v66_v19  ;;  %v80_v31 = vsub.f32 %v49_v1, %v58_v18 }
  0xb1   :  { %v75_v23 = vadd.f32 1e-05, %v73_v20  ;;  %v72_v24 = vsub.f32 %v68_v22, %v70_v21 }
  0xb3   :  { %221 = vrsqrt.f32 %v75_v23  ;;  %v74_v25 = vmax.f32 %v72_v24, 0.0 }
  0xb5   :  { %v76_v26 = vadd.f32 1e-05, %v74_v25 }
  0xb7   :  { %223 = vrsqrt.f32 %v76_v26 }
  0xc0   :  { %v222_v28 = vpop.eup %221 }
  0xc1   :  { %v81_v29 = vmul.f32 %v222_v28, %v79_v27 }
  0xc3   :  { %v196_v30 = vpack.c.bf16 %v81_v29, %v81_v29 }
  0xc4   :  { %v224_v32 = vpop.eup %223 }
  0xc5   :  { %92 = vst.msk [vmem:[#allocation2] sm:$0xf] %vm91_vm2, %v196_v30  ;;  %v82_v33 = vmul.f32 %v224_v32, %v80_v31 }
  0xc7   :  { %v197_v34 = vpack.c.bf16 %v82_v33, %v82_v33 }
  0xc9   :  { %93 = vst.msk [vmem:[#allocation2 + $0x4] sm:$0xf] %vm91_vm2, %v197_v34 }
  0xd0   :  { %v220_v35 = vld [vmem:[#allocation2] sm:$0xff]  }
  0xd1   :  { %206 = vmatmul.mubr.msk.bf16.vlgmr.msra.gmra.mxu0 %vm50_vm0, %v220_v35 }
 0x191   :  { %v162_v37 = vpop.f32.mrf.mxu0 }
 0x192   :  { %v163_v38 = vadd.f32 %v191_v36, %v162_v37 }
 0x193   :  { %v207_v39 = vpop.f32.mrf.mxu0 }
 0x194   :  { %169 = vst.msk [vmem:[#allocation8] sm:$0xff] %vm50_vm0, %v163_v38 }
 0x195   :  { %v165_v40 = vpop.f32.mrf.mxu0 }
 0x196   :  { %v166_v41 = vadd.f32 %v191_v36, %v165_v40 }
 0x197   :  { %v208_v42 = vpop.f32.mrf.mxu0 }
 0x198   :  { %170 = vst.msk [vmem:[#allocation8 + $0x8] sm:$0xff] %vm50_vm0, %v166_v41 }
 0x199   :  { %276 = shalt.err (!%p273_p0)
}
 0x19a   :  { %182 = dma.vmem_to_hbm [thread:$0]  %s177_s27, 256, %s348_s3, [#allocation5], %s292_s15, %s292_s15, %s293_s16  }
 0x19b   :  { %289 = dma.done.wait [#allocation5], 256  }
 0x19c   :  { %290 = vsyncadd [#allocation5], 4294967040 }
 0x19d   :  { %186 = vsyncpa [#allocation4], 1 }
 0x19e   :  { %187 = vsyncpa [#allocation7], 1 }
 0x19f   :  { %188 = vsyncpa [#allocation5], 1 }

</bundles_post_ra>
